<compile_context>
chip_gen: v7x
topology: tpu7x:2x2x1
jax: 0.10.0
libtpu: 0.0.40
codegen_flags: <defaults>
</compile_context>

<pallas_src>
import functools

import jax
import jax.numpy as jnp
from jax import lax
from jax.experimental import pallas as pl
from jax.experimental.pallas import tpu as pltpu

_LANES = 128


# ---------------------------------------------------------------------------
# Kernels
# ---------------------------------------------------------------------------
def _attention_body(q_ref, k_ref, v_ref, scale):
    # q_ref: (tq, D), k_ref: (Lk, D), v_ref: (Lk, Dv_pad) -- batch dim squeezed by BlockSpec.
    q = q_ref[...]
    if scale:  # matches PyTorch's `if scale:` (None / 0 skip the scaling)
        q = q * jnp.asarray(scale, dtype=q.dtype)
    k = k_ref[...]
    v = v_ref[...]

    # scores: contract over D directly (no materialized k.T), f32 accumulation on the MXU.
    s = lax.dot_general(
        q, k,
        dimension_numbers=(((1,), (1,)), ((), ())),
        preferred_element_type=jnp.float32,
    )

    # numerically-stable softmax over the last axis, all f32.
    m = jnp.max(s, axis=-1, keepdims=True)
    e = jnp.exp(s - m)
    denom = jnp.sum(e, axis=-1, keepdims=True)
    inv = 1.0 / denom  # exact; returned attention rows sum to 1

    # context with deferred normalization: (e @ v) * inv -> tq*Dv muls instead of tq*Lk
    # on the context path; matmul operands stay in the input dtype for the fast MXU path.
    ctx = lax.dot_general(
        e.astype(v.dtype), v,
        dimension_numbers=(((1,), (0,)), ((), ())),
        preferred_element_type=jnp.float32,
    ) * inv

    # dropout(p=0.0) is identity at inference; see TODO(synk) above for p > 0.
    return ctx, e, inv


def _sdpa_kernel(q_ref, k_ref, v_ref, ctx_ref, attn_ref, *, scale):
    ctx, e, inv = _attention_body(q_ref, k_ref, v_ref, scale)
    attn_ref[...] = (e * inv).astype(attn_ref.dtype)
    ctx_ref[...] = ctx.astype(ctx_ref.dtype)


def _sdpa_kernel_ctx_only(q_ref, k_ref, v_ref, ctx_ref, *, scale):
    ctx, _, _ = _attention_body(q_ref, k_ref, v_ref, scale)
    ctx_ref[...] = ctx.astype(ctx_ref.dtype)


# ---------------------------------------------------------------------------
# Wrapper helpers
# ---------------------------------------------------------------------------
def _vmem_capacity_bytes():
    try:
        return int(pltpu.get_tpu_info().vmem_capacity_bytes)
    except Exception:
        return 64 * 1024 * 1024  # v7x floor (most conservative assumption)


def _pick_q_tile(lq, min_tile, fits):
    """Largest q tile (<=256, multiple of min_tile) dividing Lq that fits the VMEM budget."""
    cands = [c for c in (256, 128, 64, 32, 16, 8) if c >= min_tile]
    divisors = [c for c in cands if lq >= c and lq % c == 0]
    for c in divisors:          # descending: biggest tile that fits wins
        if fits(c):
            return c
    if divisors:                # nothing fits the budget: take the smallest legal tile
        return divisors[-1]
    return lq                   # tiny / odd Lq: one full-length block (always layout-legal)


# ---------------------------------------------------------------------------
# Public entry point
# ---------------------------------------------------------------------------
def scaled_dot_product_attention(q, k, v, scale=64.0, *, tq=None,
                                 attn_dtype=None, return_attention=True):
    """q: [B, Lq, D], k: [B, Lk, D], v: [B, Lk, Dv].

    Returns (context [B, Lq, Dv], attention [B, Lq, Lk]) like the PyTorch module,
    or just context when return_attention=False (saves the dominant HBM writeback).
    For multi-head use, fold heads into the batch axis before calling.
    """
    B, Lq, D = q.shape
    Bk, Lk, Dk = k.shape
    Bv, Lkv, Dv = v.shape
    assert (Bk, Dk) == (B, D) and (Bv, Lkv) == (B, Lk)

    q_bytes = jnp.dtype(q.dtype).itemsize
    k_bytes = jnp.dtype(k.dtype).itemsize
    v_bytes = jnp.dtype(v.dtype).itemsize
    ctx_dtype = q.dtype
    attn_dt = jnp.dtype(attn_dtype) if attn_dtype is not None else jnp.dtype(q.dtype)
    ctx_bytes = jnp.dtype(ctx_dtype).itemsize
    attn_bytes = attn_dt.itemsize

    # Lane-dense ctx writeback: pad Dv up to a multiple of 128 (zero columns -> zero ctx,
    # sliced off after the call).
    Dv_pad = -(-Dv // _LANES) * _LANES
    v_in = v if Dv_pad == Dv else jnp.pad(v, ((0, 0), (0, 0), (0, Dv_pad - Dv)))
    # TODO(synk): the attention output's last dim is Lk (not lane-padded); padding it would
    # require -inf masking of padded key columns.

    # Per-grid-step VMEM footprint (K/V single-buffered, everything else double-buffered,
    # plus the f32 softmax intermediates).
    def footprint(t):
        f = 2 * t * D * q_bytes                         # q tile (double-buffered)
        f += Lk * D * k_bytes + Lk * Dv_pad * v_bytes   # resident K / V (Buffered(1))
        f += 2 * t * Dv_pad * ctx_bytes                 # ctx output tile
        if return_attention:
            f += 2 * t * Lk * attn_bytes                # attn output tile
        f += 3 * t * Lk * 4                             # f32 scores / exp / normalized attn
        f += 2 * t * Dv_pad * 4                         # f32 ctx accumulator
        return f

    cap = _vmem_capacity_bytes()
    budget = (3 * cap) // 4
    min_tq = {4: 8, 2: 16, 1: 32}.get(q_bytes, 8)       # dtype-aware sublane-tile minimum
    if tq is None:
        tq = _pick_q_tile(Lq, min_tq, lambda t: footprint(t) <= budget)
    assert Lq % tq == 0
    num_q_tiles = Lq // tq

    vmem_limit = int(min(cap, max(footprint(tq) * 5 // 4 + (8 << 20), 32 << 20)))

    flops = 2 * B * Lq * Lk * (D + Dv_pad)
    bytes_accessed = (q.size * q_bytes + k.size * k_bytes + v_in.size * v_bytes
                      + B * Lq * Dv_pad * ctx_bytes
                      + (B * Lq * Lk * attn_bytes if return_attention else 0))
    cost = pl.CostEstimate(flops=int(flops), transcendentals=int(B * Lq * Lk),
                           bytes_accessed=int(bytes_accessed))

    def run(single_buffer_kv):
        kv_mode = dict(pipeline_mode=pl.Buffered(1)) if single_buffer_kv else {}
        in_specs = [
            # Q streams per (batch, q-tile).
            pl.BlockSpec((None, tq, D), lambda b, i: (b, i, 0)),
            # K/V: same block index for every q-tile -> VMEM-resident across the Lq loop;
            # single-buffered since they only change at batch boundaries.
            pl.BlockSpec((None, Lk, D), lambda b, i: (b, 0, 0), **kv_mode),
            pl.BlockSpec((None, Lk, Dv_pad), lambda b, i: (b, 0, 0), **kv_mode),
        ]
        if return_attention:
            kernel = functools.partial(_sdpa_kernel, scale=scale)
            out_specs = [
                pl.BlockSpec((None, tq, Dv_pad), lambda b, i: (b, i, 0)),
                pl.BlockSpec((None, tq, Lk), lambda b, i: (b, i, 0)),
            ]
            out_shape = (
                jax.ShapeDtypeStruct((B, Lq, Dv_pad), ctx_dtype),
                jax.ShapeDtypeStruct((B, Lq, Lk), attn_dt),
            )
        else:
            kernel = functools.partial(_sdpa_kernel_ctx_only, scale=scale)
            out_specs = pl.BlockSpec((None, tq, Dv_pad), lambda b, i: (b, i, 0))
            out_shape = jax.ShapeDtypeStruct((B, Lq, Dv_pad), ctx_dtype)

        grid_spec = pltpu.PrefetchScalarGridSpec(
            num_scalar_prefetch=0,
            grid=(B, num_q_tiles),
            in_specs=in_specs,
            out_specs=out_specs,
        )
        out = pl.pallas_call(
            kernel,
            out_shape=out_shape,
            grid_spec=grid_spec,
            compiler_params=pltpu.CompilerParams(
                dimension_semantics=("parallel", "arbitrary"),
                vmem_limit_bytes=vmem_limit,
            ),
            cost_estimate=cost,
        )(q, k, v_in)
        return jax.block_until_ready(out)

    try:
        out = run(single_buffer_kv=True)
    except Exception:
        # pl.Buffered(1) on K/V is the only optional feature used; if this JAX build rejects
        # it, fall back to default double-buffered K/V (correctness unchanged).
        out = run(single_buffer_kv=False)

    if return_attention:
        ctx, attn = out
        if Dv_pad != Dv:
            ctx = ctx[..., :Dv]
        return ctx, attn
    ctx = out
    if Dv_pad != Dv:
        ctx = ctx[..., :Dv]
    return ctx


# ---------------------------------------------------------------------------
# Reference + demo
# ---------------------------------------------------------------------------
def _reference(q, k, v, scale=64.0):
    s = jnp.einsum("bqd,bkd->bqk", q, k)
    if scale:
        s = s * scale
    attn = jax.nn.softmax(s, axis=-1)
    ctx = jnp.einsum("bqk,bkd->bqd", attn, v)
    return ctx, attn


if __name__ == "__main__":
    key = jax.random.PRNGKey(0)
    kq, kk, kv = jax.random.split(key, 3)

    B, Lq, Lk, D, Dv = 2, 8, 8, 32, 32
    q = jax.random.normal(kq, (B, Lq, D), dtype=jnp.float32) * 0.1
    k = jax.random.normal(kk, (B, Lk, D), dtype=jnp.float32) * 0.1
    v = jax.random.normal(kv, (B, Lk, Dv), dtype=jnp.float32)

    ctx, attn = scaled_dot_product_attention(q, k, v, scale=64.0)
    jax.block_until_ready((ctx, attn))

    ctx_ref, attn_ref = _reference(q, k, v, scale=64.0)
    assert ctx.shape == (B, Lq, Dv) and attn.shape == (B, Lq, Lk)
    assert jnp.allclose(ctx, ctx_ref, atol=2e-3, rtol=2e-3), "context mismatch"
    assert jnp.allclose(attn, attn_ref, atol=2e-3, rtol=2e-3), "attention mismatch"
    # exact-division normalization: rows of the returned attention sum to 1.
    row_sums = jnp.sum(attn, axis=-1)
    assert jnp.allclose(row_sums, jnp.ones_like(row_sums), atol=1e-4), "attn rows not normalized"

    # context-only fast path (drops the [B, Lq, Lk] writeback entirely).
    ctx_only = scaled_dot_product_attention(q, k, v, scale=64.0, return_attention=False)
    jax.block_until_ready(ctx_only)
    assert jnp.allclose(ctx_only, ctx_ref, atol=2e-3, rtol=2e-3), "ctx-only mismatch"

    print("KERNEL_OK")
</pallas_src>

<mosaic_0001>
module attributes {stable_mosaic.version = 11 : i64} {
  func.func @_sdpa_kernel(%arg0: i32, %arg1: i32, %arg2: memref<1x8x32xf32, #tpu.memory_space<vmem>>, %arg3: memref<1x8x32xf32, #tpu.memory_space<vmem>>, %arg4: memref<1x8x128xf32, #tpu.memory_space<vmem>>, %arg5: memref<1x8x128xf32, #tpu.memory_space<vmem>>, %arg6: memref<1x8x8xf32, #tpu.memory_space<vmem>>) attributes {dimension_semantics = [#tpu.dimension_semantics<parallel>, #tpu.dimension_semantics<arbitrary>], iteration_bounds = array<i64: 2, 1>, scalar_prefetch = 0 : i64, scratch_operands = 0 : i64, tpu.core_type = #tpu.core_type<tc>, window_params = [{transform_indices = @transform_0, window_bounds = array<i64: 1, 8, 32>}, {pipeline_mode = #tpu.pipeline_mode<synchronous>, transform_indices = @transform_1, window_bounds = array<i64: 1, 8, 32>}, {pipeline_mode = #tpu.pipeline_mode<synchronous>, transform_indices = @transform_2, window_bounds = array<i64: 1, 8, 128>}, {transform_indices = @transform_3, window_bounds = array<i64: 1, 8, 128>}, {transform_indices = @transform_4, window_bounds = array<i64: 1, 8, 8>}]} {
    %c0 = arith.constant 0 : index
    %c0_0 = arith.constant 0 : index
    %c0_1 = arith.constant 0 : index
    %0 = vector.load %arg2[%c0, %c0_0, %c0_1] : memref<1x8x32xf32, #tpu.memory_space<vmem>>, vector<1x8x32xf32>
    %1 = vector.shape_cast %0 : vector<1x8x32xf32> to vector<8x32xf32>
    %cst = arith.constant 6.400000e+01 : f32
    %2 = vector.broadcast %cst : f32 to vector<8x32xf32>
    %3 = arith.mulf %1, %2 : vector<8x32xf32>
    %c0_2 = arith.constant 0 : index
    %c0_3 = arith.constant 0 : index
    %c0_4 = arith.constant 0 : index
    %4 = vector.load %arg3[%c0_2, %c0_3, %c0_4] : memref<1x8x32xf32, #tpu.memory_space<vmem>>, vector<1x8x32xf32>
    %5 = vector.shape_cast %4 : vector<1x8x32xf32> to vector<8x32xf32>
    %c0_5 = arith.constant 0 : index
    %c0_6 = arith.constant 0 : index
    %c0_7 = arith.constant 0 : index
    %6 = vector.load %arg4[%c0_5, %c0_6, %c0_7] : memref<1x8x128xf32, #tpu.memory_space<vmem>>, vector<1x8x128xf32>
    %7 = vector.shape_cast %6 : vector<1x8x128xf32> to vector<8x128xf32>
    %cst_8 = arith.constant dense<0.000000e+00> : vector<8x8xf32>
    %8 = tpu.matmul %3, %5, %cst_8 {dimension_numbers = #tpu.dot_dimension_numbers<[1], [1], [0], [0], [0, 0, 1, 0], [], []>} : vector<8x32xf32>, vector<8x32xf32>, vector<8x8xf32> -> vector<8x8xf32>
    %cst_9 = arith.constant dense<0xFF800000> : vector<8xf32>
    %9 = vector.multi_reduction <maximumf>, %8, %cst_9 [1] : vector<8x8xf32> to vector<8xf32>
    %10 = vector.shape_cast %9 : vector<8xf32> to vector<8x1xf32>
    %11 = vector.broadcast %10 : vector<8x1xf32> to vector<8x8xf32>
    %12 = arith.subf %8, %11 : vector<8x8xf32>
    %13 = math.exp %12 : vector<8x8xf32>
    %cst_10 = arith.constant dense<0.000000e+00> : vector<8xf32>
    %14 = vector.multi_reduction <add>, %13, %cst_10 [1] : vector<8x8xf32> to vector<8xf32>
    %15 = vector.shape_cast %14 : vector<8xf32> to vector<8x1xf32>
    %cst_11 = arith.constant 1.000000e+00 : f32
    %16 = vector.broadcast %cst_11 : f32 to vector<8x1xf32>
    %17 = arith.divf %16, %15 : vector<8x1xf32>
    %cst_12 = arith.constant dense<0.000000e+00> : vector<8x128xf32>
    %18 = tpu.matmul %13, %7, %cst_12 {dimension_numbers = #tpu.dot_dimension_numbers<[1], [0], [0], [1], [0, 0, 1, 1], [], []>} : vector<8x8xf32>, vector<8x128xf32>, vector<8x128xf32> -> vector<8x128xf32>
    %19 = vector.broadcast %17 : vector<8x1xf32> to vector<8x128xf32>
    %20 = arith.mulf %18, %19 : vector<8x128xf32>
    %21 = vector.broadcast %17 : vector<8x1xf32> to vector<8x8xf32>
    %22 = arith.mulf %13, %21 : vector<8x8xf32>
    %c0_13 = arith.constant 0 : index
    %c0_14 = arith.constant 0 : index
    %c0_15 = arith.constant 0 : index
    %23 = vector.load %arg6[%c0_13, %c0_14, %c0_15] : memref<1x8x8xf32, #tpu.memory_space<vmem>>, vector<1x8x8xf32>
    %24 = vector.shape_cast %23 : vector<1x8x8xf32> to vector<8x8xf32>
    %25 = vector.shape_cast %22 : vector<8x8xf32> to vector<1x8x8xf32>
    tpu.vector_store %arg6[%c0_13, %c0_14, %c0_15], %25 {strides = array<i32>} : memref<1x8x8xf32, #tpu.memory_space<vmem>>, vector<1x8x8xf32>,
    %c0_16 = arith.constant 0 : index
    %c0_17 = arith.constant 0 : index
    %c0_18 = arith.constant 0 : index
    %26 = vector.load %arg5[%c0_16, %c0_17, %c0_18] : memref<1x8x128xf32, #tpu.memory_space<vmem>>, vector<1x8x128xf32>
    %27 = vector.shape_cast %26 : vector<1x8x128xf32> to vector<8x128xf32>
    %28 = vector.shape_cast %20 : vector<8x128xf32> to vector<1x8x128xf32>
    tpu.vector_store %arg5[%c0_16, %c0_17, %c0_18], %28 {strides = array<i32>} : memref<1x8x128xf32, #tpu.memory_space<vmem>>, vector<1x8x128xf32>,
    return
  }
  func.func @transform_0(%arg0: i32, %arg1: i32) -> (i32, i32, i32) {
    %c0_i32 = arith.constant 0 : i32
    %c0_i32_0 = arith.constant 0 : i32
    return %arg0, %arg1, %c0_i32 : i32, i32, i32
  }
  func.func @transform_1(%arg0: i32, %arg1: i32) -> (i32, i32, i32) {
    %c0_i32 = arith.constant 0 : i32
    %c0_i32_0 = arith.constant 0 : i32
    %c0_i32_1 = arith.constant 0 : i32
    return %arg0, %c0_i32, %c0_i32_0 : i32, i32, i32
  }
  func.func @transform_2(%arg0: i32, %arg1: i32) -> (i32, i32, i32) {
    %c0_i32 = arith.constant 0 : i32
    %c0_i32_0 = arith.constant 0 : i32
    %c0_i32_1 = arith.constant 0 : i32
    return %arg0, %c0_i32, %c0_i32_0 : i32, i32, i32
  }
  func.func @transform_3(%arg0: i32, %arg1: i32) -> (i32, i32, i32) {
    %c0_i32 = arith.constant 0 : i32
    %c0_i32_0 = arith.constant 0 : i32
    return %arg0, %arg1, %c0_i32 : i32, i32, i32
  }
  func.func @transform_4(%arg0: i32, %arg1: i32) -> (i32, i32, i32) {
    %c0_i32 = arith.constant 0 : i32
    %c0_i32_0 = arith.constant 0 : i32
    return %arg0, %arg1, %c0_i32 : i32, i32, i32
  }
}

module attributes {stable_mosaic.version = 11 : i64} {
  func.func @_sdpa_kernel(%arg0: i32, %arg1: i32, %arg2: memref<1x8x32xf32, #tpu.memory_space<vmem>>, %arg3: memref<1x8x32xf32, #tpu.memory_space<vmem>>, %arg4: memref<1x8x128xf32, #tpu.memory_space<vmem>>, %arg5: memref<1x8x128xf32, #tpu.memory_space<vmem>>, %arg6: memref<1x8x8xf32, #tpu.memory_space<vmem>>) attributes {dimension_semantics = [#tpu.dimension_semantics<parallel>, #tpu.dimension_semantics<arbitrary>], iteration_bounds = array<i64: 2, 1>, scalar_prefetch = 0 : i64, scratch_operands = 0 : i64, tpu.core_type = #tpu.core_type<tc>, window_params = [{transform_indices = @transform_0, window_bounds = array<i64: 1, 8, 32>}, {transform_indices = @transform_1, window_bounds = array<i64: 1, 8, 32>}, {transform_indices = @transform_2, window_bounds = array<i64: 1, 8, 128>}, {transform_indices = @transform_3, window_bounds = array<i64: 1, 8, 128>}, {transform_indices = @transform_4, window_bounds = array<i64: 1, 8, 8>}]} {
    %c0 = arith.constant 0 : index
    %c0_0 = arith.constant 0 : index
    %c0_1 = arith.constant 0 : index
    %0 = vector.load %arg2[%c0, %c0_0, %c0_1] : memref<1x8x32xf32, #tpu.memory_space<vmem>>, vector<1x8x32xf32>
    %1 = vector.shape_cast %0 : vector<1x8x32xf32> to vector<8x32xf32>
    %cst = arith.constant 6.400000e+01 : f32
    %2 = vector.broadcast %cst : f32 to vector<8x32xf32>
    %3 = arith.mulf %1, %2 : vector<8x32xf32>
    %c0_2 = arith.constant 0 : index
    %c0_3 = arith.constant 0 : index
    %c0_4 = arith.constant 0 : index
    %4 = vector.load %arg3[%c0_2, %c0_3, %c0_4] : memref<1x8x32xf32, #tpu.memory_space<vmem>>, vector<1x8x32xf32>
    %5 = vector.shape_cast %4 : vector<1x8x32xf32> to vector<8x32xf32>
    %c0_5 = arith.constant 0 : index
    %c0_6 = arith.constant 0 : index
    %c0_7 = arith.constant 0 : index
    %6 = vector.load %arg4[%c0_5, %c0_6, %c0_7] : memref<1x8x128xf32, #tpu.memory_space<vmem>>, vector<1x8x128xf32>
    %7 = vector.shape_cast %6 : vector<1x8x128xf32> to vector<8x128xf32>
    %cst_8 = arith.constant dense<0.000000e+00> : vector<8x8xf32>
    %8 = tpu.matmul %3, %5, %cst_8 {dimension_numbers = #tpu.dot_dimension_numbers<[1], [1], [0], [0], [0, 0, 1, 0], [], []>} : vector<8x32xf32>, vector<8x32xf32>, vector<8x8xf32> -> vector<8x8xf32>
    %cst_9 = arith.constant dense<0xFF800000> : vector<8xf32>
    %9 = vector.multi_reduction <maximumf>, %8, %cst_9 [1] : vector<8x8xf32> to vector<8xf32>
    %10 = vector.shape_cast %9 : vector<8xf32> to vector<8x1xf32>
    %11 = vector.broadcast %10 : vector<8x1xf32> to vector<8x8xf32>
    %12 = arith.subf %8, %11 : vector<8x8xf32>
    %13 = math.exp %12 : vector<8x8xf32>
    %cst_10 = arith.constant dense<0.000000e+00> : vector<8xf32>
    %14 = vector.multi_reduction <add>, %13, %cst_10 [1] : vector<8x8xf32> to vector<8xf32>
    %15 = vector.shape_cast %14 : vector<8xf32> to vector<8x1xf32>
    %cst_11 = arith.constant 1.000000e+00 : f32
    %16 = vector.broadcast %cst_11 : f32 to vector<8x1xf32>
    %17 = arith.divf %16, %15 : vector<8x1xf32>
    %cst_12 = arith.constant dense<0.000000e+00> : vector<8x128xf32>
    %18 = tpu.matmul %13, %7, %cst_12 {dimension_numbers = #tpu.dot_dimension_numbers<[1], [0], [0], [1], [0, 0, 1, 1], [], []>} : vector<8x8xf32>, vector<8x128xf32>, vector<8x128xf32> -> vector<8x128xf32>
    %19 = vector.broadcast %17 : vector<8x1xf32> to vector<8x128xf32>
    %20 = arith.mulf %18, %19 : vector<8x128xf32>
    %21 = vector.broadcast %17 : vector<8x1xf32> to vector<8x8xf32>
    %22 = arith.mulf %13, %21 : vector<8x8xf32>
    %c0_13 = arith.constant 0 : index
    %c0_14 = arith.constant 0 : index
    %c0_15 = arith.constant 0 : index
    %23 = vector.load %arg6[%c0_13, %c0_14, %c0_15] : memref<1x8x8xf32, #tpu.memory_space<vmem>>, vector<1x8x8xf32>
    %24 = vector.shape_cast %23 : vector<1x8x8xf32> to vector<8x8xf32>
    %25 = vector.shape_cast %22 : vector<8x8xf32> to vector<1x8x8xf32>
    tpu.vector_store %arg6[%c0_13, %c0_14, %c0_15], %25 {strides = array<i32>} : memref<1x8x8xf32, #tpu.memory_space<vmem>>, vector<1x8x8xf32>,
    %c0_16 = arith.constant 0 : index
    %c0_17 = arith.constant 0 : index
    %c0_18 = arith.constant 0 : index
    %26 = vector.load %arg5[%c0_16, %c0_17, %c0_18] : memref<1x8x128xf32, #tpu.memory_space<vmem>>, vector<1x8x128xf32>
    %27 = vector.shape_cast %26 : vector<1x8x128xf32> to vector<8x128xf32>
    %28 = vector.shape_cast %20 : vector<8x128xf32> to vector<1x8x128xf32>
    tpu.vector_store %arg5[%c0_16, %c0_17, %c0_18], %28 {strides = array<i32>} : memref<1x8x128xf32, #tpu.memory_space<vmem>>, vector<1x8x128xf32>,
    return
  }
  func.func @transform_0(%arg0: i32, %arg1: i32) -> (i32, i32, i32) {
    %c0_i32 = arith.constant 0 : i32
    %c0_i32_0 = arith.constant 0 : i32
    return %arg0, %arg1, %c0_i32 : i32, i32, i32
  }
  func.func @transform_1(%arg0: i32, %arg1: i32) -> (i32, i32, i32) {
    %c0_i32 = arith.constant 0 : i32
    %c0_i32_0 = arith.constant 0 : i32
    %c0_i32_1 = arith.constant 0 : i32
    return %arg0, %c0_i32, %c0_i32_0 : i32, i32, i32
  }
  func.func @transform_2(%arg0: i32, %arg1: i32) -> (i32, i32, i32) {
    %c0_i32 = arith.constant 0 : i32
    %c0_i32_0 = arith.constant 0 : i32
    %c0_i32_1 = arith.constant 0 : i32
    return %arg0, %c0_i32, %c0_i32_0 : i32, i32, i32
  }
  func.func @transform_3(%arg0: i32, %arg1: i32) -> (i32, i32, i32) {
    %c0_i32 = arith.constant 0 : i32
    %c0_i32_0 = arith.constant 0 : i32
    return %arg0, %arg1, %c0_i32 : i32, i32, i32
  }
  func.func @transform_4(%arg0: i32, %arg1: i32) -> (i32, i32, i32) {
    %c0_i32 = arith.constant 0 : i32
    %c0_i32_0 = arith.constant 0 : i32
    return %arg0, %arg1, %c0_i32 : i32, i32, i32
  }
}

</mosaic_0001>

<bundles_post_ra>
// kernel: tpu_custom_call.1
= control target key start
LH: loop header
LB: loop body
LE: loop exit
PB: predicated region body
PF: predicated region fallthrough
CT: control target
= control target key end

     0   :  { %10 = vsyncpa [#allocation3], 0  ;;  %s1271_s0 = inlined_call_operand.hbm [shape: f32[2,8,32], index: 0, kind: input, shape index: {}]   ;;  %s1272_s1 = inlined_call_operand.hbm [shape: f32[2,8,32], index: 1, kind: input, shape index: {}]   ;;  %s1273_s2 = inlined_call_operand.hbm [shape: f32[2,8,128], index: 2, kind: input, shape index: {}]   ;;  %s1274_s3 = inlined_call_operand.hbm [shape: f32[2,8,128], index: 3, kind: output, shape index: {0}]   ;;  %s1275_s4 = inlined_call_operand.hbm [shape: f32[2,8,8], index: 4, kind: output, shape index: {1}]  }
   0x1   :  { %12 = vsyncpa [#allocation3 + $0x1], 0 }
   0x2   :  { %13 = vsyncpa [#allocation6], 0 }
   0x3   :  { %14 = vsyncpa [#allocation4], 0 }
   0x4   :  { %16 = vsyncpa [#allocation4 + $0x1], 0 }
   0x5   :  { %17 = vsyncpa [#allocation10], 0 }
   0x6   :  { %19 = vsyncpa [#allocation10 + $0x1], 0  ;;  %s985_s15 = smov 0   ;;  %s987_s16 = smov 0  }
   0x7   :  { %s989_s17 = smov 0   ;;  %s991_s18 = smov 0  }
   0x8   :  { %s993_s19 = smov 0   ;;  %s995_s20 = smov 0  }
   0x9 LB: > { %s622_s21 = sadd.s32 4294967295, %s951_s20   ;;  %s623_s22 = sadd.s32 4294967294, %s951_s20   ;;  %s951_s20 = sphi %s995_s20, %s25_s20   ;;  %s947_s19 = sphi %s993_s19, %s1295_s19   ;;  %s943_s18 = sphi %s991_s18, %s1294_s18   ;;  %s939_s17 = sphi %s989_s17, %s1293_s17   ;;  %s935_s16 = sphi %s987_s16, %s1292_s16   ;;  %s931_s15 = sphi %s985_s15, %s1291_s15  }
   0xa   : > { %p59_p0 = scmp.ne.s32.totalorder %s935_s16, %s931_s15  ;;  %p60_p1 = scmp.eq.s32.totalorder %s622_s21, 0 }
   0xb   : > { %p1017_p2 = scmp.eq.s32.totalorder %s622_s21, 1  ;;  %p143_p3 = scmp.eq.s32.totalorder %s623_s22, 1 }
   0xc   : > { %p1021_p4 = por %p60_p1, %p59_p0  ;;  %p624_p5 = scmp.ge.s32.totalorder %s951_s20, 1 }
   0xd   : > { %s1279_s23 = scalar_select %p1017_p2, 1, 0 }
   0xe   : > { %s1280_s24 = scalar_select %p1021_p4, 1, 0 }
   0xf   : > { %p1026_p6 = por %p143_p3, %p59_p0  ;;  %p178_p7 = scmp.lt.s32.totalorder %s951_s20, 3 }
  0x10   : > { %s1031_s26 = sshll.u32 %s943_s18, 7  ;;  %s953_s5 = smov [#allocation5]  }
  0x11   : > { %s1281_s25 = scalar_select %p1026_p6, 1, 0 }
  0x12   : > { %p1033_p8 = pnand %p624_p5, %p178_p7  ;;  %s1041_s30 = scalar_lea.hbm %s1272_s1, %s1031_s26 }
  0x13   : > { %s193_s6 = sshll.u32 %s953_s5, 4  ;;  %s1050_s9 = scalar_lea.hbm %s1273_s2, %s1031_s26  ;;  %s194_s6 = int_to_ptr.vmem [resolvable:$true] %s193_s6 }
  0x14   : > { %s1282_s27 = scalar_select %p1033_p8, 1, 0 }
  0x15   : > { %p667_p10 = pneg %p1033_p8  ;;  %s954_s11 = smov [#allocation7]  }
  0x16   : > { %s206_s12 = sshll.u32 %s954_s11, 4  ;;  %s743_s13 = scalar_lea.hbm %s1041_s30, 128  ;;  %s1058_s12 = int_to_ptr.vmem [resolvable:$true] %s206_s12 }
  0x17   : > { %p1054_p11 = pnand %p667_p10, %p1021_p4  ;;  %p744_p12 = scmp.ne.s32.totalorder %s1041_s30, %s743_s13 }
  0x18   : > { %s748_s21 = scalar_lea.hbm %s1272_s1, 256  ;;  %p749_p3 = scmp.lt.u32.totalorder %s1041_s30, %s1272_s1 }
  0x19   : > { %p745_p13 = pneg %p1054_p11  ;;  %p750_p5 = scmp.lt.u32.totalorder %s748_s21, %s743_s13 }
  0x1a   : > { %p752_p10 = scmp.lt.u32.totalorder %s743_s13, %s1041_s30 }
  0x1b   : > { %p746_p0 = pnand %p745_p13, %p744_p12  ;;  %p751_p7 = por %p750_p5, %p749_p3 }
  0x1d   : > { %p747_p1 = pneg %p746_p0  ;;  %p753_p9 = por %p752_p10, %p751_p7 }
  0x1f   : > { %p754_p6 = pnand %p753_p9, %p747_p1 }
  0x21   : > { %757 = shalt.err (!%p754_p6)
}
  0x22   : > { %s758_s29 = scalar_lea.vmem %s194_s6, 128  ;;  %p766_p8 = scmp.lt.s32.totalorder %s194_s6, %s194_s6 }
  0x23   : > { %p759_p4 = scmp.ne.s32.totalorder %s194_s6, %s758_s29  ;;  %p767_p2 = scmp.lt.s32.totalorder %s758_s29, %s758_s29 }
  0x25   : > { %p761_p12 = pnand %p759_p4, %p745_p13  ;;  %p768_p3 = por %p767_p2, %p766_p8 }
  0x27   : > { %p762_p0 = pneg %p761_p12 }
  0x29   : > { %p769_p5 = pnand %p768_p3, %p762_p0 }
  0x2b   : > { %772 = shalt.err (!%p769_p5)
}
  0x2c   : > { %670 = dma.hbm_to_vmem [thread:$0]  (!%p1054_p11), %s1041_s30, 128, %s194_s6, [#allocation6]  }
  0x2d   : > { %s773_s5 = scalar_lea.hbm %s1050_s9, 128  ;;  %s778_s11 = scalar_lea.hbm %s1273_s2, 256 }
  0x2e   : > { %p774_p6 = scmp.ne.s32.totalorder %s1050_s9, %s773_s5  ;;  %p779_p2 = scmp.lt.u32.totalorder %s1050_s9, %s1273_s2 }
  0x2f   : > { %p780_p8 = scmp.lt.u32.totalorder %s778_s11, %s773_s5  ;;  %p782_p7 = scmp.lt.u32.totalorder %s773_s5, %s1050_s9 }
  0x30   : > { %p776_p4 = pnand %p774_p6, %p745_p13 }
  0x31   : > { %p781_p1 = por %p780_p8, %p779_p2 }
  0x32   : > { %p777_p9 = pneg %p776_p4 }
  0x33   : > { %p783_p10 = por %p782_p7, %p781_p1 }
  0x35   : > { %p784_p12 = pnand %p783_p10, %p777_p9 }
  0x37   : > { %787 = shalt.err (!%p784_p12)
}
  0x38   : > { %s788_s30 = scalar_lea.vmem %s1058_s12, 128  ;;  %p796_p6 = scmp.lt.s32.totalorder %s1058_s12, %s1058_s12 }
  0x39   : > { %p789_p0 = scmp.ne.s32.totalorder %s1058_s12, %s788_s30  ;;  %p797_p4 = scmp.lt.s32.totalorder %s788_s30, %s788_s30 }
  0x3b   : > { %p791_p3 = pnand %p789_p0, %p745_p13  ;;  %p798_p2 = por %p797_p4, %p796_p6 }
  0x3d   : > { %p792_p5 = pneg %p791_p3 }
  0x3f   : > { %p799_p8 = pnand %p798_p2, %p792_p5 }
  0x41   : > { %802 = shalt.err (!%p799_p8)
}
  0x42   : > { %673 = dma.hbm_to_vmem [thread:$0]  (!%p1054_p11), %s1050_s9, 128, %s1058_s12, [#allocation6]  }
  0x43   : > { %s37_s6 = sadd.s32 1, %s947_s19  ;;  %s46_s18 = sadd.s32 1, %s939_s17 }
  0x44   : > { %p39_p13 = scmp.ge.s32.totalorder %s37_s6, 2  ;;  %p53_p9 = scmp.ne.s32.totalorder %s939_s17, %s935_s16 }
  0x45   : > { %p54_p1 = scmp.eq.s32.totalorder %s951_s20, 0  ;;  %p685_p7 = scmp.lt.s32.totalorder %s951_s20, 2 }
  0x46   : > { %s1297_s6 = smov (%p39_p13, %s37_s6), 0  ;;  %p1284_p12 = scmp.ne.s32.totalorder %s1279_s23, 0 }
  0x47   : > { %p55_p10 = por %p54_p1, %p53_p9  ;;  %s41_s21 = ssub.s32 %s947_s19, %s1297_s6 }
  0x48   : > { %p1115_p0 = por %p1284_p12, %p53_p9  ;;  %s217_s22 = sand.u32 1, %s939_s17  }
  0x49   : > { %p44_p3 = scmp.eq.s32.totalorder %s41_s21, 0  ;;  %s628_s9 = sshll.u32 %s217_s22, 3 }
  0x4a   : > { %s629_s12 = sshll.u32 %s947_s19, 7  ;;  %s221_s23 = scalar_lea.vmem [#allocation2], %s628_s9 }
  0x4b   : > { %s1124_s28 = scalar_select %p44_p3, %s939_s17, %s46_s18  }
  0x4c   : > { %s1129_s7 = scalar_lea.hbm %s1271_s0, %s629_s12  ;;  %s229_s8 = sshll.u32 %s221_s23, 4  ;;  %s1137_s8 = int_to_ptr.vmem [resolvable:$true] %s229_s8 }
  0x4d   : > { %p1133_p11 = pnand %p685_p7, %p55_p10  ;;  %s218_s13 = scalar_lea.sflag [#allocation3], %s217_s22 }
  0x4e   : > { %s803_s14 = scalar_lea.hbm %s1129_s7, 128  ;;  %s808_s21 = scalar_lea.hbm %s1271_s0, 256 }
  0x4f   : > { %p804_p5 = scmp.ne.s32.totalorder %s1129_s7, %s803_s14  ;;  %p805_p6 = pneg %p1133_p11 }
  0x50   : > { %p809_p8 = scmp.lt.u32.totalorder %s1129_s7, %s1271_s0  ;;  %p810_p13 = scmp.lt.u32.totalorder %s808_s21, %s803_s14 }
  0x51   : > { %p806_p4 = pnand %p805_p6, %p804_p5  ;;  %p812_p1 = scmp.lt.u32.totalorder %s803_s14, %s1129_s7 }
  0x52   : > { %p811_p9 = por %p810_p13, %p809_p8 }
  0x53   : > { %p807_p2 = pneg %p806_p4 }
  0x54   : > { %p813_p7 = por %p812_p1, %p811_p9 }
  0x56   : > { %p814_p10 = pnand %p813_p7, %p807_p2 }
  0x58   : > { %817 = shalt.err (!%p814_p10)
}
  0x59   : > { %s818_s22 = scalar_lea.vmem %s1137_s8, 128  ;;  %s955_s29 = smov [#allocation2]  }
  0x5a   : > { %p819_p12 = scmp.ne.s32.totalorder %s1137_s8, %s818_s22  ;;  %s823_s5 = sshll.u32 %s955_s29, 4  ;;  %s824_s5 = int_to_ptr.vmem [resolvable:$false] %s823_s5 }
  0x5b   : > { %s825_s23 = scalar_lea.vmem %s824_s5, 256  ;;  %p826_p4 = scmp.lt.s32.totalorder %s1137_s8, %s824_s5 }
  0x5c   : > { %p821_p3 = pnand %p819_p12, %p805_p6  ;;  %p827_p8 = scmp.lt.s32.totalorder %s825_s23, %s818_s22 }
  0x5e   : > { %p822_p5 = pneg %p821_p3  ;;  %p828_p13 = por %p827_p8, %p826_p4 }
  0x60   : > { %p829_p9 = pnand %p828_p13, %p822_p5 }
  0x62   : > { %832 = shalt.err (!%p829_p9)
}
  0x63   : > { %677 = dma.hbm_to_vmem [thread:$0]  (!%p1133_p11), %s1129_s7, 128, %s1137_s8, %s218_s13  }
  0x64   : > { %p1287_p2 = scmp.ne.s32.totalorder %s1282_s27, 0 }
  0x65   : > { %s1167_s14 = sand.u32 (!%p1287_p2), 1, %s935_s16   ;;  %p1288_p6 = scmp.ne.s32.totalorder (!%p1287_p2), %s1280_s24, 0 }
  0x66   : > { %238 = sbr.rel (%p1287_p2) target bundleno = 716 (0x2cc), region = 32  ;;  %s1170_s30 = sshll.u32 (!%p1287_p2), %s1167_s14, 3 }
  0x67   : > { %s241_s18 = scalar_lea.sflag (!%p1287_p2), [#allocation3], %s1167_s14  ;;  %s244_s21 = scalar_lea.vmem (!%p1287_p2), [#allocation2], %s1170_s30 }
  0x6d   : > { %914 = dma.done.wait (%p1288_p6), %s241_s18, 128  }
  0x6e   : > { %916 = vsyncadd (%p1288_p6), %s241_s18, 4294967168 }
  0x6f   : > { %918 = dma.done.wait (%p1288_p6), [#allocation6], 256  }
  0x70   : > { %920 = vsyncadd (%p1288_p6), [#allocation6], 4294967040  ;;  %v956_v0 = vmov 0.0   ;;  %vm957_vm0 = vmmov 0   ;;  %vm286_vm1 = vcmask 261120   ;;  %v284_v1 = vld [vmem:[#allocation5] sm:$0xff]  ;;  %s1190_s11 = scalar_lea.hbm %s1275_s4, %s1031_s26 }
  0x71   : > { %647 = vmatprep.subr.mxu0 %v956_v0  ;;  %649 = vmatprep.mubr.msk.f32.mxu0 %vm957_vm0, %v956_v0  ;;  %v282_v2 = vld [vmem:[%s244_s21] sm:$0xff]  ;;  %vm363_vm2 = vcmask 64512   ;;  %v285_v7 = vld [vmem:[#allocation7] sm:$0xff]  ;;  %s281_s24 = scalar_lea.vmem [#allocation9], %s1170_s30  ;;  %s458_s13 = scalar_lea.sflag [#allocation10], %s1167_s14 }
  0x72   : > { %652 = vmatprep.subr.mxu1 %v956_v0  ;;  %654 = vmatprep.mubr.msk.f32.mxu1 %vm957_vm0, %v956_v0  ;;  %v283_v3 = vmul.f32 64.0, %v282_v2  ;;  %s486_s27 = sshll.u32 %s281_s24, 4  ;;  %s958_s12 = smov [#allocation9]   ;;  %s1192_s27 = int_to_ptr.vmem [resolvable:$true] %s486_s27 }
  0x73   : > { %648 = vmatpush3.xpose.msk.msra.mxu0 %vm286_vm1, %v284_v1  ;;  %653 = vmatpush3.msra.mxu1 %v285_v7  ;;  %s833_s9 = scalar_lea.vmem %s1192_s27, 128  ;;  %s837_s22 = sshll.u32 %s958_s12, 4  ;;  %s838_s22 = int_to_ptr.vmem [resolvable:$false] %s837_s22 }
  0x74   : > { %p834_p11 = scmp.ne.s32.totalorder %s1192_s27, %s833_s9  ;;  %s839_s29 = scalar_lea.vmem %s838_s22, 256 }
  0x75   : > { %p840_p10 = scmp.lt.s32.totalorder %s1192_s27, %s838_s22  ;;  %p841_p12 = scmp.lt.s32.totalorder %s839_s29, %s833_s9 }
  0x76   : > { %650 = vmatmul.mubr.msk.f32.vlgmr.msra.gmra.mrb[0].mxu0 %vm286_vm1, %v283_v3  ;;  %p835_p1 = pnand %p834_p11, %p1115_p0 }
  0x77   : > { %p842_p3 = por %p841_p12, %p840_p10 }
  0x78   : > { %p836_p7 = pneg %p835_p1 }
  0x7a   : > { %p843_p5 = pnand %p842_p3, %p836_p7 }
 0x149   : > { %v359_v4 = vpop.f32.mrb[0].mxu0 }
 0x14a   : > { %v651_v5 = vpop.f32.mrb[1].mxu0  ;;  %v364_v6 = vsel %vm363_vm2, %v359_v4, -inf }
 0x14b   : > { %365 = vmax.xlane.f32.xlu0 %v364_v6 }
 0x1d8   : > { %v366_v8 = vpop.xlane.xlu0 %365 }
 0x1d9   : > { %v367_v9 = vsub.f32 %v359_v4, %v366_v8 }
 0x1db   : > { %v368_v10 = vmul.f32 1.442695, %v367_v9 }
 0x1dd   : > { %739 = vpow2.f32 %v368_v10 }
 0x1e7   : > { %v740_v11 = vpop.eup %739 }
 0x1e8   : > { %655 = vmatmul.mubr.msk.f32.vlgmr.msra.gmra.mrb[0].mxu1 %vm363_vm2, %v740_v11  ;;  %v370_v12 = vsel %vm363_vm2, %v740_v11, 0.0 }
 0x1e9   : > { %371 = vadd.xlane.f32.xlu0 %v370_v12 }
 0x276   : > { %v372_v13 = vpop.xlane.xlu0 %371 }
 0x277   : > { %741 = vrcp.f32 %v372_v13 }
 0x281   : > { %v742_v14 = vpop.eup %741 }
 0x282   : > { %v449_v15 = vmul.f32 %v742_v14, %v740_v11 }
 0x284   : > { %450 = vst.msk [vmem:[%s281_s24] sm:$0xff] %vm363_vm2, %v449_v15 }
 0x285   : > { %846 = shalt.err (!%p843_p5)
}
 0x286   : > { %s847_s5 = scalar_lea.hbm %s1190_s11, 128  ;;  %s851_s21 = scalar_lea.hbm %s1275_s4, 256 }
 0x287   : > { %p848_p4 = scmp.ne.s32.totalorder %s1190_s11, %s847_s5  ;;  %p852_p9 = scmp.lt.u32.totalorder %s1190_s11, %s1275_s4 }
 0x288   : > { %p853_p2 = scmp.lt.u32.totalorder %s851_s21, %s847_s5  ;;  %p855_p11 = scmp.lt.u32.totalorder %s847_s5, %s1190_s11 }
 0x289   : > { %p849_p8 = pnand %p848_p4, %p1115_p0 }
 0x28a   : > { %p854_p6 = por %p853_p2, %p852_p9 }
 0x28b   : > { %p850_p13 = pneg %p849_p8 }
 0x28c   : > { %p856_p1 = por %p855_p11, %p854_p6 }
 0x28e   : > { %p857_p7 = pnand %p856_p1, %p850_p13 }
 0x290   : > { %860 = shalt.err (!%p857_p7)
}
 0x291   : > { %664 = dma.vmem_to_hbm [thread:$0]  (%p1115_p0), %s1192_s27, 128, %s1190_s11, %s458_s13  }
 0x292   : > { %s274_s8 = scalar_lea.vmem [#allocation8], %s1170_s30  ;;  %s1222_s29 = scalar_lea.hbm %s1274_s3, %s1031_s26 }
 0x293   : > { %s472_s9 = sshll.u32 %s274_s8, 4  ;;  %s453_s5 = scalar_lea.sflag [#allocation4], %s1167_s14  ;;  %s1224_s9 = int_to_ptr.vmem [resolvable:$true] %s472_s9 }
 0x294   : > { %s861_s23 = scalar_lea.vmem %s1224_s9, 128  ;;  %s959_s30 = smov [#allocation8]  }
 0x295   : > { %p862_p10 = scmp.ne.s32.totalorder %s1224_s9, %s861_s23  ;;  %s865_s27 = sshll.u32 %s959_s30, 4  ;;  %s866_s27 = int_to_ptr.vmem [resolvable:$false] %s865_s27 }
 0x296   : > { %s867_s11 = scalar_lea.vmem %s866_s27, 256  ;;  %p868_p5 = scmp.lt.s32.totalorder %s1224_s9, %s866_s27 }
 0x297   : > { %p863_p12 = pnand %p862_p10, %p1115_p0  ;;  %p869_p4 = scmp.lt.s32.totalorder %s867_s11, %s861_s23 }
 0x299   : > { %p864_p3 = pneg %p863_p12  ;;  %p870_p8 = por %p869_p4, %p868_p5 }
 0x29b   : > { %p871_p13 = pnand %p870_p8, %p864_p3 }
 0x2bb   : > { %v444_v16 = vpop.f32.mrb[0].mxu1 }
 0x2bc   : > { %v448_v17 = vmul.f32 %v742_v14, %v444_v16  ;;  %v656_v18 = vpop.f32.mrb[1].mxu1 }
 0x2be   : > { %451 = vst [vmem:[%s274_s8] sm:$0xff] %v448_v17 }
 0x2bf   : > { %874 = shalt.err (!%p871_p13)
}
 0x2c0   : > { %s875_s26 = scalar_lea.hbm %s1222_s29, 128  ;;  %s879_s18 = scalar_lea.hbm %s1274_s3, 256 }
 0x2c1   : > { %p876_p9 = scmp.ne.s32.totalorder %s1222_s29, %s875_s26  ;;  %p880_p11 = scmp.lt.u32.totalorder %s1222_s29, %s1274_s3 }
 0x2c2   : > { %p881_p1 = scmp.lt.u32.totalorder %s879_s18, %s875_s26  ;;  %p883_p10 = scmp.lt.u32.totalorder %s875_s26, %s1222_s29 }
 0x2c3   : > { %p877_p2 = pnand %p876_p9, %p1115_p0 }
 0x2c4   : > { %p882_p7 = por %p881_p1, %p880_p11 }
 0x2c5   : > { %p878_p6 = pneg %p877_p2 }
 0x2c6   : > { %p884_p12 = por %p883_p10, %p882_p7 }
 0x2c8   : > { %p885_p3 = pnand %p884_p12, %p878_p6 }
 0x2ca   : > { %888 = shalt.err (!%p885_p3)
}
 0x2cb   : > { %663 = dma.vmem_to_hbm [thread:$0]  (%p1115_p0), %s1224_s9, 128, %s1222_s29, %s453_s5  }
 0x2cc PF: > { %s498_s7 = sand.u32 1, %s931_s15   ;;  %p1289_p5 = scmp.ne.s32.totalorder %s1281_s25, 0 }
 0x2cd   : > { %p1290_p4 = scmp.ge.s32.totalorder %s951_s20, 2  ;;  %s499_s8 = scalar_lea.sflag [#allocation4], %s498_s7 }
 0x2cf   : > { %p679_p8 = pnand %p1290_p4, %p1289_p5 }
 0x2d1   : > { %922 = dma.done.wait (!%p679_p8), %s499_s8, 128  }
 0x2d2   : > { %924 = vsyncadd (!%p679_p8), %s499_s8, 4294967168  ;;  %s508_s12 = scalar_lea.sflag [#allocation10], %s498_s7 }
 0x2d3   : > { %926 = dma.done.wait (!%p679_p8), %s508_s12, 128  }
 0x2d4   : > { %928 = vsyncadd (!%p679_p8), %s508_s12, 4294967168  ;;  %s25_s20 = sadd.s32 1, %s951_s20   ;;  %s1291_s15 = smov %s935_s16 }
 0x2d5   : > { %p22_p13 = scmp.ge.s32.totalorder %s25_s20, 4   ;;  %s1292_s16 = smov %s939_s17 }
 0x2d6   : > { %s1293_s17 = smov %s1124_s28  ;;  %s1294_s18 = smov %s947_s19 }
 0x2d7   : > { %s1295_s19 = smov %s1297_s6  ;;  %24 = sbr.rel (!%p22_p13) target bundleno = 9 (0x9), region = 104 }
 0x2de   :  { %513 = vsyncpa [#allocation3], 1 }
 0x2df   :  { %515 = vsyncpa [#allocation3 + $0x1], 1 }
 0x2e0   :  { %516 = vsyncpa [#allocation6], 1 }
 0x2e1   :  { %517 = vsyncpa [#allocation4], 1 }
 0x2e2   :  { %519 = vsyncpa [#allocation4 + $0x1], 1 }
 0x2e3   :  { %520 = vsyncpa [#allocation10], 1 }
 0x2e4   :  { %522 = vsyncpa [#allocation10 + $0x1], 1 }

// kernel: tpu_custom_call.1
= control target key start
LH: loop header
LB: loop body
LE: loop exit
PB: predicated region body
PF: predicated region fallthrough
CT: control target
= control target key end

     0   :  { %s1340_s0 = inlined_call_operand.hbm [shape: f32[2,8,32], index: 0, kind: input, shape index: {}]   ;;  %s1341_s1 = inlined_call_operand.hbm [shape: f32[2,8,32], index: 1, kind: input, shape index: {}]   ;;  %s1342_s2 = inlined_call_operand.hbm [shape: f32[2,8,128], index: 2, kind: input, shape index: {}]   ;;  %s1343_s3 = inlined_call_operand.hbm [shape: f32[2,8,128], index: 3, kind: output, shape index: {0}]   ;;  %s1344_s4 = inlined_call_operand.hbm [shape: f32[2,8,8], index: 4, kind: output, shape index: {1}]  }
   0x1   :  { %1353 = sst [smem:[#allocation19_spill]] %s1341_s1 }
   0x2   :  { %10 = vsyncpa [#allocation3], 0 }
   0x3   :  { %12 = vsyncpa [#allocation3 + $0x1], 0 }
   0x4   :  { %13 = vsyncpa [#allocation6], 0 }
   0x5   :  { %15 = vsyncpa [#allocation6 + $0x1], 0 }
   0x6   :  { %16 = vsyncpa [#allocation4], 0 }
   0x7   :  { %18 = vsyncpa [#allocation4 + $0x1], 0 }
   0x8   :  { %19 = vsyncpa [#allocation10], 0 }
   0x9   :  { %21 = vsyncpa [#allocation10 + $0x1], 0  ;;  %s1038_s15 = smov 0   ;;  %s1040_s16 = smov 0  }
   0xa   :  { %s1042_s17 = smov 0   ;;  %s1044_s18 = smov 0  }
   0xb   :  { %s1046_s19 = smov 0   ;;  %s1048_s20 = smov 0  }
   0xc LB: > { %1354 = sst [smem:[#allocation15_spill]] %s1000_s19  ;;  %s1069_s21 = sadd.s32 4294967295, %s1004_s20   ;;  %s1004_s20 = sphi %s1048_s20, %s27_s20   ;;  %s1000_s19 = sphi %s1046_s19, %s1378_s19   ;;  %s996_s18 = sphi %s1044_s18, %s1377_s18   ;;  %s992_s17 = sphi %s1042_s17, %s1381_s17   ;;  %s988_s16 = sphi %s1040_s16, %s1380_s16   ;;  %s984_s15 = sphi %s1038_s15, %s1379_s15  }
   0xd   : > { %1355 = sst [smem:[#allocation16_spill]] %s1004_s20  ;;  %s675_s22 = sadd.s32 4294967294, %s1004_s20  }
   0xe   : > { %s39_s23 = sadd.s32 1, %s1000_s19  ;;  %s48_s24 = sadd.s32 1, %s992_s17 }
   0xf   : > { %p41_p0 = scmp.ge.s32.totalorder %s39_s23, 2  ;;  %p55_p1 = scmp.ne.s32.totalorder %s992_s17, %s988_s16 }
  0x10   : > { %p56_p2 = scmp.eq.s32.totalorder %s1004_s20, 0  ;;  %p61_p3 = scmp.ne.s32.totalorder %s988_s16, %s984_s15 }
  0x11   : > { %s1383_s23 = smov (%p41_p0, %s39_s23), 0  ;;  %p62_p5 = scmp.eq.s32.totalorder %s1069_s21, 0 }
  0x12   : > { %1356 = sst [smem:[#allocation17_spill]] %s1383_s23  ;;  %p1081_p4 = por %p56_p2, %p55_p1 }
  0x13   : > { %s43_s26 = ssub.s32 %s1000_s19, %s1383_s23  ;;  %p139_p6 = scmp.eq.s32.totalorder %s1069_s21, 1 }
  0x14   : > { %p46_p7 = scmp.eq.s32.totalorder %s43_s26, 0  ;;  %p1089_p8 = por %p62_p5, %p61_p3 }
  0x15   : > { %p1093_p9 = por %p139_p6, %p55_p1  ;;  %p145_p10 = scmp.eq.s32.totalorder %s675_s22, 1 }
  0x16   : > { %s1358_s27 = scalar_select %p1089_p8, 1, 0 }
  0x17   : > { %s1359_s28 = scalar_select %p1093_p9, 1, 0 }
  0x18   : > { %s1098_s29 = scalar_select %p46_p7, %s992_s17, %s48_s24  }
  0x19   : > { %p1100_p11 = por %p145_p10, %p61_p3  ;;  %p740_p13 = scmp.lt.s32.totalorder %s1004_s20, 2 }
  0x1a   : > { %1360 = sst [smem:[#allocation18_spill]] %s1098_s29  ;;  %s1345_s5 = sand.u32 1, %s992_s17  }
  0x1b   : > { %s1361_s30 = scalar_select %p1100_p11, 1, 0 }
  0x1c   : > { %s1109_s6 = sshll.u32 %s1345_s5, 3  ;;  %s1112_s7 = sshll.u32 %s1000_s19, 7 }
  0x1d   : > { %p1116_p0 = pnand %p740_p13, %p1081_p4  ;;  %s212_s9 = sand.u32 1, %s1004_s20  }
  0x1e   : > { %s1363_s1 = sld [smem:[#allocation19_spill]]  ;;  %s216_s13 = scalar_lea.vmem [#allocation5], %s1109_s6 }
  0x1f   : > { %s1362_s8 = scalar_select %p1116_p0, 1, 0 }
  0x20   : > { %s223_s14 = sshll.u32 %s216_s13, 4  ;;  %s1132_s22 = scalar_lea.sflag [#allocation6], %s212_s9  ;;  %s1129_s14 = int_to_ptr.vmem [resolvable:$true] %s223_s14 }
  0x21   : > { %p1138_p4 = pneg %p1116_p0 }
  0x24   : > { %s1125_s12 = scalar_lea.hbm %s1363_s1, %s1112_s7  ;;  %s801_s11 = scalar_lea.hbm %s1363_s1, 256 }
  0x25   : > { %s796_s24 = scalar_lea.hbm %s1125_s12, 128  ;;  %p802_p7 = scmp.lt.u32.totalorder %s1125_s12, %s1363_s1 }
  0x26   : > { %p797_p3 = scmp.ne.s32.totalorder %s1125_s12, %s796_s24  ;;  %p803_p10 = scmp.lt.u32.totalorder %s801_s11, %s796_s24 }
  0x27   : > { %p805_p12 = scmp.lt.u32.totalorder %s796_s24, %s1125_s12 }
  0x28   : > { %p799_p5 = pnand %p1138_p4, %p797_p3  ;;  %p804_p13 = por %p803_p10, %p802_p7 }
  0x2a   : > { %p800_p6 = pneg %p799_p5  ;;  %p806_p1 = por %p805_p12, %p804_p13 }
  0x2c   : > { %p807_p2 = pnand %p806_p1, %p800_p6 }
  0x2e   : > { %810 = shalt.err (!%p807_p2)
}
  0x2f   : > { %s811_s9 = scalar_lea.vmem %s1129_s14, 128  ;;  %s1006_s26 = smov [#allocation5]  }
  0x30   : > { %p812_p3 = scmp.ne.s32.totalorder %s1129_s14, %s811_s9  ;;  %s816_s10 = sshll.u32 %s1006_s26, 4  ;;  %s817_s10 = int_to_ptr.vmem [resolvable:$false] %s816_s10 }
  0x31   : > { %s818_s5 = scalar_lea.vmem %s817_s10, 256  ;;  %p819_p9 = scmp.lt.s32.totalorder %s1129_s14, %s817_s10 }
  0x32   : > { %p814_p5 = pnand %p812_p3, %p1138_p4  ;;  %p820_p8 = scmp.lt.s32.totalorder %s818_s5, %s811_s9 }
  0x34   : > { %p815_p11 = pneg %p814_p5  ;;  %p821_p7 = por %p820_p8, %p819_p9 }
  0x36   : > { %p822_p10 = pnand %p821_p7, %p815_p11 }
  0x38   : > { %825 = shalt.err (!%p822_p10)
}
  0x39   : > { %729 = dma.hbm_to_vmem [thread:$0]  (!%p1116_p0), %s1125_s12, 128, %s1129_s14, %s1132_s22  }
  0x3a   : > { %p1365_p12 = scmp.lt.s32.totalorder %s1004_s20, 3  ;;  %p1366_p1 = scmp.ge.s32.totalorder %s1004_s20, 1 }
  0x3b   : > { %s1174_s9 = scalar_lea.hbm %s1340_s0, %s1112_s7  ;;  %s197_s26 = scalar_lea.vmem [#allocation2], %s1109_s6 }
  0x3c   : > { %p1166_p2 = pnand %p1366_p1, %p1365_p12  ;;  %s205_s10 = sshll.u32 %s197_s26, 4  ;;  %s1177_s10 = int_to_ptr.vmem [resolvable:$true] %s205_s10 }
  0x3d   : > { %s1183_s5 = scalar_lea.hbm %s1342_s2, %s1112_s7  ;;  %s1368_s1 = sand.u32 1, %s992_s17  }
  0x3e   : > { %s1367_s24 = scalar_select %p1166_p2, 1, 0 }
  0x3f   : > { %s194_s23 = scalar_lea.sflag [#allocation3], %s1368_s1  ;;  %s826_s19 = scalar_lea.hbm %s1174_s9, 128 }
  0x40   : > { %p827_p8 = scmp.ne.s32.totalorder %s1174_s9, %s826_s19  ;;  %s831_s29 = scalar_lea.hbm %s1340_s0, 256 }
  0x41   : > { %p832_p6 = scmp.lt.u32.totalorder %s1174_s9, %s1340_s0  ;;  %p833_p13 = scmp.lt.u32.totalorder %s831_s29, %s826_s19 }
  0x42   : > { %p829_p9 = pnand %p827_p8, %p1138_p4  ;;  %p835_p5 = scmp.lt.u32.totalorder %s826_s19, %s1174_s9 }
  0x43   : > { %p834_p3 = por %p833_p13, %p832_p6 }
  0x44   : > { %p830_p11 = pneg %p829_p9 }
  0x45   : > { %p836_p7 = por %p835_p5, %p834_p3 }
  0x47   : > { %p837_p10 = pnand %p836_p7, %p830_p11 }
  0x49   : > { %840 = shalt.err (!%p837_p10)
}
  0x4a   : > { %s841_s1 = scalar_lea.vmem %s1177_s10, 128  ;;  %s1007_s7 = smov [#allocation2]  }
  0x4b   : > { %p842_p12 = scmp.ne.s32.totalorder %s1177_s10, %s841_s1  ;;  %s846_s12 = sshll.u32 %s1007_s7, 4  ;;  %s847_s12 = int_to_ptr.vmem [resolvable:$false] %s846_s12 }
  0x4c   : > { %s848_s20 = scalar_lea.vmem %s847_s12, 256  ;;  %p849_p9 = scmp.lt.s32.totalorder %s1177_s10, %s847_s12 }
  0x4d   : > { %p844_p1 = pnand %p842_p12, %p1138_p4  ;;  %p850_p2 = scmp.lt.s32.totalorder %s848_s20, %s841_s1 }
  0x4f   : > { %p845_p8 = pneg %p844_p1  ;;  %p851_p6 = por %p850_p2, %p849_p9 }
  0x51   : > { %p852_p13 = pnand %p851_p6, %p845_p8 }
  0x53   : > { %855 = shalt.err (!%p852_p13)
}
  0x54   : > { %726 = dma.hbm_to_vmem [thread:$0]  (!%p1116_p0), %s1174_s9, 128, %s1177_s10, %s194_s23  }
  0x55   : > { %s234_s19 = scalar_lea.vmem [#allocation7], %s1109_s6  ;;  %s856_s14 = scalar_lea.hbm %s1183_s5, 128 }
  0x56   : > { %s241_s29 = sshll.u32 %s234_s19, 4  ;;  %p857_p11 = scmp.ne.s32.totalorder %s1183_s5, %s856_s14  ;;  %s242_s29 = int_to_ptr.vmem [resolvable:$true] %s241_s29 }
  0x57   : > { %s861_s26 = scalar_lea.hbm %s1342_s2, 256  ;;  %p862_p5 = scmp.lt.u32.totalorder %s1183_s5, %s1342_s2 }
  0x58   : > { %p859_p2 = pnand %p857_p11, %p1138_p4  ;;  %p863_p7 = scmp.lt.u32.totalorder %s861_s26, %s856_s14 }
  0x59   : > { %p865_p12 = scmp.lt.u32.totalorder %s856_s14, %s1183_s5 }
  0x5a   : > { %p860_p3 = pneg %p859_p2  ;;  %p864_p10 = por %p863_p7, %p862_p5 }
  0x5c   : > { %p866_p1 = por %p865_p12, %p864_p10 }
  0x5e   : > { %p867_p8 = pnand %p866_p1, %p860_p3 }
  0x60   : > { %870 = shalt.err (!%p867_p8)
}
  0x61   : > { %s871_s23 = scalar_lea.vmem %s242_s29, 128  ;;  %s1008_s6 = smov [#allocation7]  }
  0x62   : > { %p872_p9 = scmp.ne.s32.totalorder %s242_s29, %s871_s23  ;;  %s876_s9 = sshll.u32 %s1008_s6, 4  ;;  %s877_s9 = int_to_ptr.vmem [resolvable:$false] %s876_s9 }
  0x63   : > { %s878_s10 = scalar_lea.vmem %s877_s9, 256  ;;  %p879_p11 = scmp.lt.s32.totalorder %s242_s29, %s877_s9 }
  0x64   : > { %p874_p6 = pnand %p872_p9, %p1138_p4  ;;  %p880_p2 = scmp.lt.s32.totalorder %s878_s10, %s871_s23 }
  0x66   : > { %p875_p13 = pneg %p874_p6  ;;  %p881_p0 = por %p880_p2, %p879_p11 }
  0x68   : > { %p882_p5 = pnand %p881_p0, %p875_p13 }
  0x6a   : > { %885 = shalt.err (!%p882_p5)
}
  0x6b   : > { %p1369_p7 = scmp.ne.s32.totalorder %s1362_s8, 0  ;;  %p1370_p3 = scmp.ne.s32.totalorder %s1367_s24, 0 }
  0x6c   : > { %s1230_s25 = sand.u32 (!%p1370_p3), 1, %s988_s16   ;;  %p1371_p0 = scmp.ne.s32.totalorder (!%p1370_p3), %s1358_s27, 0 }
  0x6d   : > { %732 = dma.hbm_to_vmem [thread:$0]  (!%p1369_p7), %s1183_s5, 128, %s242_s29, %s1132_s22  }
  0x6e   : > { %250 = sbr.rel (%p1370_p3) target bundleno = 725 (0x2d5), region = 32  ;;  %s1233_s12 = sshll.u32 (!%p1370_p3), %s1230_s25, 3 }
  0x6f   : > { %s253_s20 = scalar_lea.sflag (!%p1370_p3), [#allocation3], %s1230_s25  ;;  %s256_s19 = scalar_lea.vmem (!%p1370_p3), [#allocation2], %s1233_s12 }
  0x75   : > { %967 = dma.done.wait (%p1371_p0), %s253_s20, 128  }
  0x76   : > { %969 = vsyncadd (%p1371_p0), %s253_s20, 4294967168  ;;  %s261_s8 = sand.u32 1, %s1069_s21   ;;  %s265_s24 = scalar_lea.vmem [#allocation5], %s1233_s12 }
  0x77   : > { %s262_s22 = scalar_lea.sflag [#allocation6], %s261_s8 }
  0x78   : > { %971 = dma.done.wait (%p1371_p0), %s262_s22, 256  }
  0x79   : > { %973 = vsyncadd (%p1371_p0), %s262_s22, 4294967040  ;;  %v1009_v0 = vmov 0.0   ;;  %vm1010_vm0 = vmmov 0   ;;  %vm318_vm1 = vcmask 261120   ;;  %v316_v1 = vld [vmem:[%s265_s24] sm:$0xff]  ;;  %v314_v2 = vld [vmem:[%s256_s19] sm:$0xff] }
  0x7a   : > { %703 = vmatprep.subr.mxu0 %v1009_v0  ;;  %705 = vmatprep.mubr.msk.f32.mxu0 %vm1010_vm0, %v1009_v0  ;;  %v315_v3 = vmul.f32 64.0, %v314_v2  ;;  %vm395_vm2 = vcmask 64512   ;;  %s274_s21 = scalar_lea.vmem [#allocation7], %s1233_s12  ;;  %s695_s27 = sshll.u32 %s996_s18, 7 }
  0x7b   : > { %708 = vmatprep.subr.mxu1 %v1009_v0  ;;  %710 = vmatprep.mubr.msk.f32.mxu1 %vm1010_vm0, %v1009_v0  ;;  %v317_v7 = vld [vmem:[%s274_s21] sm:$0xff]  ;;  %s313_s5 = scalar_lea.vmem [#allocation9], %s1233_s12  ;;  %s1258_s13 = scalar_lea.hbm %s1344_s4, %s695_s27 }
  0x7c   : > { %704 = vmatpush3.xpose.msk.msra.mxu0 %vm318_vm1, %v316_v1  ;;  %709 = vmatpush3.msra.mxu1 %v317_v7  ;;  %s518_s29 = sshll.u32 %s313_s5, 4  ;;  %s490_s26 = scalar_lea.sflag [#allocation10], %s1230_s25  ;;  %s1260_s29 = int_to_ptr.vmem [resolvable:$true] %s518_s29 }
  0x7d   : > { %s886_s1 = scalar_lea.vmem %s1260_s29, 128  ;;  %p1372_p10 = scmp.ne.s32.totalorder %s1359_s28, 0 }
  0x7e   : > { %p887_p4 = scmp.ne.s32.totalorder %s1260_s29, %s886_s1  ;;  %s1011_s7 = smov [#allocation9]  }
  0x7f   : > { %706 = vmatmul.mubr.msk.f32.vlgmr.msra.gmra.mrb[0].mxu0 %vm318_vm1, %v315_v3  ;;  %s890_s23 = sshll.u32 %s1011_s7, 4  ;;  %s891_s23 = int_to_ptr.vmem [resolvable:$false] %s890_s23 }
  0x80   : > { %p888_p12 = pnand %p887_p4, %p1372_p10  ;;  %s892_s6 = scalar_lea.vmem %s891_s23, 256 }
  0x81   : > { %p893_p8 = scmp.lt.s32.totalorder %s1260_s29, %s891_s23  ;;  %p894_p9 = scmp.lt.s32.totalorder %s892_s6, %s886_s1 }
  0x82   : > { %p889_p1 = pneg %p888_p12 }
  0x83   : > { %p895_p6 = por %p894_p9, %p893_p8 }
  0x85   : > { %p896_p13 = pnand %p895_p6, %p889_p1 }
 0x152   : > { %v391_v4 = vpop.f32.mrb[0].mxu0 }
 0x153   : > { %v707_v5 = vpop.f32.mrb[1].mxu0  ;;  %v396_v6 = vsel %vm395_vm2, %v391_v4, -inf }
 0x154   : > { %397 = vmax.xlane.f32.xlu0 %v396_v6 }
 0x1e1   : > { %v398_v8 = vpop.xlane.xlu0 %397 }
 0x1e2   : > { %v399_v9 = vsub.f32 %v391_v4, %v398_v8 }
 0x1e4   : > { %v400_v10 = vmul.f32 1.442695, %v399_v9 }
 0x1e6   : > { %792 = vpow2.f32 %v400_v10 }
 0x1f0   : > { %v793_v11 = vpop.eup %792 }
 0x1f1   : > { %711 = vmatmul.mubr.msk.f32.vlgmr.msra.gmra.mrb[0].mxu1 %vm395_vm2, %v793_v11  ;;  %v402_v12 = vsel %vm395_vm2, %v793_v11, 0.0 }
 0x1f2   : > { %403 = vadd.xlane.f32.xlu0 %v402_v12 }
 0x27f   : > { %v404_v13 = vpop.xlane.xlu0 %403 }
 0x280   : > { %794 = vrcp.f32 %v404_v13 }
 0x28a   : > { %v795_v14 = vpop.eup %794 }
 0x28b   : > { %v481_v15 = vmul.f32 %v795_v14, %v793_v11 }
 0x28d   : > { %482 = vst.msk [vmem:[%s313_s5] sm:$0xff] %vm395_vm2, %v481_v15 }
 0x28e   : > { %899 = shalt.err (!%p896_p13)
}
 0x28f   : > { %s900_s9 = scalar_lea.hbm %s1258_s13, 128  ;;  %s904_s19 = scalar_lea.hbm %s1344_s4, 256 }
 0x290   : > { %p901_p11 = scmp.ne.s32.totalorder %s1258_s13, %s900_s9  ;;  %p905_p7 = scmp.lt.u32.totalorder %s1258_s13, %s1344_s4 }
 0x291   : > { %p906_p3 = scmp.lt.u32.totalorder %s904_s19, %s900_s9  ;;  %p908_p4 = scmp.lt.u32.totalorder %s900_s9, %s1258_s13 }
 0x292   : > { %p902_p2 = pnand %p901_p11, %p1372_p10 }
 0x293   : > { %p907_p0 = por %p906_p3, %p905_p7 }
 0x294   : > { %p903_p5 = pneg %p902_p2 }
 0x295   : > { %p909_p12 = por %p908_p4, %p907_p0 }
 0x297   : > { %p910_p1 = pnand %p909_p12, %p903_p5 }
 0x299   : > { %913 = shalt.err (!%p910_p1)
}
 0x29a   : > { %720 = dma.vmem_to_hbm [thread:$0]  (%p1372_p10), %s1260_s29, 128, %s1258_s13, %s490_s26  }
 0x29b   : > { %s306_s24 = scalar_lea.vmem [#allocation8], %s1233_s12  ;;  %s1291_s11 = scalar_lea.hbm %s1343_s3, %s695_s27 }
 0x29c   : > { %s504_s21 = sshll.u32 %s306_s24, 4  ;;  %s485_s1 = scalar_lea.sflag [#allocation4], %s1230_s25  ;;  %s1293_s21 = int_to_ptr.vmem [resolvable:$true] %s504_s21 }
 0x29d   : > { %s914_s7 = scalar_lea.vmem %s1293_s21, 128  ;;  %s1012_s12 = smov [#allocation8]  }
 0x29e   : > { %p915_p8 = scmp.ne.s32.totalorder %s1293_s21, %s914_s7  ;;  %s918_s29 = sshll.u32 %s1012_s12, 4  ;;  %s919_s29 = int_to_ptr.vmem [resolvable:$false] %s918_s29 }
 0x29f   : > { %s920_s18 = scalar_lea.vmem %s919_s29, 256  ;;  %p921_p13 = scmp.lt.s32.totalorder %s1293_s21, %s919_s29 }
 0x2a0   : > { %p916_p9 = pnand %p915_p8, %p1372_p10  ;;  %p922_p11 = scmp.lt.s32.totalorder %s920_s18, %s914_s7 }
 0x2a2   : > { %p917_p6 = pneg %p916_p9  ;;  %p923_p2 = por %p922_p11, %p921_p13 }
 0x2a4   : > { %p924_p5 = pnand %p923_p2, %p917_p6 }
 0x2c4   : > { %v476_v16 = vpop.f32.mrb[0].mxu1 }
 0x2c5   : > { %v480_v17 = vmul.f32 %v795_v14, %v476_v16  ;;  %v712_v18 = vpop.f32.mrb[1].mxu1 }
 0x2c7   : > { %483 = vst [vmem:[%s306_s24] sm:$0xff] %v480_v17 }
 0x2c8   : > { %927 = shalt.err (!%p924_p5)
}
 0x2c9   : > { %s928_s25 = scalar_lea.hbm %s1291_s11, 128  ;;  %s932_s26 = scalar_lea.hbm %s1343_s3, 256 }
 0x2ca   : > { %p929_p7 = scmp.ne.s32.totalorder %s1291_s11, %s928_s25  ;;  %p933_p4 = scmp.lt.u32.totalorder %s1291_s11, %s1343_s3 }
 0x2cb   : > { %p934_p12 = scmp.lt.u32.totalorder %s932_s26, %s928_s25  ;;  %p936_p8 = scmp.lt.u32.totalorder %s928_s25, %s1291_s11 }
 0x2cc   : > { %p930_p3 = pnand %p929_p7, %p1372_p10 }
 0x2cd   : > { %p935_p1 = por %p934_p12, %p933_p4 }
 0x2ce   : > { %p931_p0 = pneg %p930_p3 }
 0x2cf   : > { %p937_p9 = por %p936_p8, %p935_p1 }
 0x2d1   : > { %p938_p6 = pnand %p937_p9, %p931_p0 }
 0x2d3   : > { %941 = shalt.err (!%p938_p6)
}
 0x2d4   : > { %719 = dma.vmem_to_hbm [thread:$0]  (%p1372_p10), %s1293_s21, 128, %s1291_s11, %s485_s1  }
 0x2d5 PF: > { %s1373_s9 = sld [smem:[#allocation16_spill]]  ;;  %s530_s10 = sand.u32 1, %s984_s15  }
 0x2d6   : > { %p1374_p13 = scmp.ne.s32.totalorder %s1361_s30, 0  ;;  %s531_s20 = scalar_lea.sflag [#allocation4], %s530_s10 }
 0x2db   : > { %p1375_p11 = scmp.ge.s32.totalorder %s1373_s9, 2 }
 0x2dd   : > { %p734_p2 = pnand %p1375_p11, %p1374_p13 }
 0x2df   : > { %975 = dma.done.wait (!%p734_p2), %s531_s20, 128  }
 0x2e0   : > { %977 = vsyncadd (!%p734_p2), %s531_s20, 4294967168  ;;  %s540_s19 = scalar_lea.sflag [#allocation10], %s530_s10 }
 0x2e1   : > { %979 = dma.done.wait (!%p734_p2), %s540_s19, 128  }
 0x2e2   : > { %981 = vsyncadd (!%p734_p2), %s540_s19, 4294967168  ;;  %s27_s20 = sadd.s32 1, %s1373_s9   ;;  %s1376_s28 = sld [smem:[#allocation18_spill]] }
 0x2e3   : > { %p24_p5 = scmp.ge.s32.totalorder %s27_s20, 4   ;;  %s1377_s18 = sld [smem:[#allocation15_spill]] }
 0x2e4   : > { %s1378_s19 = sld [smem:[#allocation17_spill]]  ;;  %s1379_s15 = smov %s988_s16 }
 0x2e5   : > { %s1380_s16 = smov %s992_s17  ;;  %26 = sbr.rel (!%p24_p5) target bundleno = 12 (0xc), region = 118 }
 0x2e8   : > { %s1381_s17 = smov %s1376_s28 }
 0x2ec   :  { %545 = vsyncpa [#allocation3], 1 }
 0x2ed   :  { %547 = vsyncpa [#allocation3 + $0x1], 1 }
 0x2ee   :  { %548 = vsyncpa [#allocation6], 1 }
 0x2ef   :  { %550 = vsyncpa [#allocation6 + $0x1], 1 }
 0x2f0   :  { %551 = vsyncpa [#allocation4], 1 }
 0x2f1   :  { %553 = vsyncpa [#allocation4 + $0x1], 1 }
 0x2f2   :  { %554 = vsyncpa [#allocation10], 1 }
 0x2f3   :  { %556 = vsyncpa [#allocation10 + $0x1], 1 }

</bundles_post_ra>
